<compile_context>
chip_gen: v5e
topology: v5e:2x2
jax: 0.10.0
libtpu: 0.0.40
codegen_flags: <defaults>
</compile_context>

<pallas_src>
import functools

import jax
import jax.numpy as jnp
from jax.experimental import pallas as pl
from jax.experimental.pallas import tpu as pltpu

LANES = 128   # TPU lane width; everything is kept lane-dense at 128
FEA = 42      # feature width of the reference model
HID = 20      # hidden width of the reference model


# ---------------------------------------------------------------------------
# Kernel
# ---------------------------------------------------------------------------
def cdann_kernel(x_ref, y_ref, w_ref, out_ref, *, num_class, num_domain):
    f32 = jnp.float32
    x = x_ref[...]                                  # (TB, 128); lanes [0:channel_num] valid, rest 0
    y = y_ref[...]                                  # (TB, 1) int32 labels

    # Carve the packed parameter slab with static slices (cheap views).
    w_fea = w_ref[0 * LANES:1 * LANES, :]           # Feature stand-in  (128, 128)
    w_l1  = w_ref[1 * LANES:2 * LANES, :]           # fused layer-1 fan-out
    w_l2  = w_ref[2 * LANES:3 * LANES, :]           # block-diagonal layer-2
    w_l3  = w_ref[3 * LANES:4 * LANES, :]           # block-diagonal layer-3
    b_fea = w_ref[4 * LANES + 0:4 * LANES + 1, :]   # (1, 128) bias rows
    b_l1  = w_ref[4 * LANES + 1:4 * LANES + 2, :]
    b_l2  = w_ref[4 * LANES + 2:4 * LANES + 3, :]
    b_l3  = w_ref[4 * LANES + 3:4 * LANES + 4, :]

    # Zero-padding in x / weights / biases guarantees all pad lanes stay 0.
    fea = jnp.maximum(jnp.dot(x, w_fea, preferred_element_type=f32) + b_fea, 0.0)
    h1 = jnp.maximum(jnp.dot(fea, w_l1, preferred_element_type=f32) + b_l1, 0.0)
    # h2 cols: [0:nc] task logits | [nc:nc+20] prior hid2 | [.. +20*c ..] cond-c hid2
    h2 = jnp.dot(h1, w_l2, preferred_element_type=f32) + b_l2
    # layer-3 rows for the task columns are zero, so ReLU-ing them is harmless.
    h3 = jnp.dot(jnp.maximum(h2, 0.0), w_l3, preferred_element_type=f32) + b_l3
    # h3 cols: [0:nd] pd | [nd*(1+c) : nd*(2+c)] cond-classifier-c output

    task = h2[:, 0:num_class]                       # pre-ReLU task logits
    pd = h3[:, 0:num_domain]
    cd = jnp.zeros_like(pd)
    for c in range(num_class):                      # static, tiny unroll
        sel = (y == c).astype(f32)                  # (TB, 1) row mask
        cd = cd + sel * h3[:, num_domain * (1 + c):num_domain * (2 + c)]

    # Single fused lane-dense output block: [task | pd | cd | zero pad].
    out_ref[...] = jnp.zeros(out_ref.shape, f32)
    out_ref[:, 0:num_class] = task
    out_ref[:, num_class:num_class + num_domain] = pd
    out_ref[:, num_class + num_domain:num_class + 2 * num_domain] = cd


# ---------------------------------------------------------------------------
# Parameter construction / packing
# ---------------------------------------------------------------------------
def _init_linear(key, in_dim, out_dim):
    """Deterministic PyTorch-style nn.Linear init: U(-1/sqrt(fan_in), 1/sqrt(fan_in))."""
    bound = 1.0 / (in_dim ** 0.5)
    kw, kb = jax.random.split(key)
    w = jax.random.uniform(kw, (in_dim, out_dim), jnp.float32, -bound, bound)
    b = jax.random.uniform(kb, (1, out_dim), jnp.float32, -bound, bound)
    return w, b


def make_cdann_params(key, channel_num=30, num_class=2, num_domain=6):
    keys = jax.random.split(key, 7 + 3 * num_class)
    wf, bf = _init_linear(keys[0], channel_num, FEA)          # Feature stand-in
    wt1, bt1 = _init_linear(keys[1], FEA, HID)                # TaskClassifier
    wt2, bt2 = _init_linear(keys[2], HID, num_class)
    wp1, bp1 = _init_linear(keys[3], FEA, HID)                # prior domain classifier
    wp2, bp2 = _init_linear(keys[4], HID, HID)
    wp3, bp3 = _init_linear(keys[5], HID, num_domain)
    c1, c2, c3 = [], [], []
    for c in range(num_class):                                # conditional domain classifiers
        c1.append(_init_linear(keys[6 + 3 * c + 0], FEA, HID))
        c2.append(_init_linear(keys[6 + 3 * c + 1], HID, HID))
        c3.append(_init_linear(keys[6 + 3 * c + 2], HID, num_domain))
    wc1 = jnp.stack([w for w, _ in c1]); bc1 = jnp.stack([b for _, b in c1])
    wc2 = jnp.stack([w for w, _ in c2]); bc2 = jnp.stack([b for _, b in c2])
    wc3 = jnp.stack([w for w, _ in c3]); bc3 = jnp.stack([b for _, b in c3])
    return (wf, bf, wt1, bt1, wt2, bt2,
            wp1, bp1, wp2, bp2, wp3, bp3,
            wc1, bc1, wc2, bc2, wc3, bc3)


def pack_cdann_params(params, channel_num=30, num_class=2, num_domain=6):
    """Pack all weights/biases into one lane-dense (520, 128) f32 slab."""
    (wf, bf, wt1, bt1, wt2, bt2,
     wp1, bp1, wp2, bp2, wp3, bp3,
     wc1, bc1, wc2, bc2, wc3, bc3) = params

    assert HID * (2 + num_class) <= LANES, "fused layer-1 width must fit 128 lanes"
    assert num_class + HID * (1 + num_class) <= LANES, "fused layer-2 width must fit 128 lanes"
    assert num_domain * (1 + num_class) <= LANES, "fused layer-3 width must fit 128 lanes"

    def block(w, row_off=0):
        blk = jnp.zeros((LANES, LANES), jnp.float32)
        return blk.at[row_off:row_off + w.shape[0], 0:w.shape[1]].set(w)

    # Stage 0: Feature stand-in (channel_num -> 42).
    blk_f = block(wf)

    # Stage 1: fan-out from fea -> concat along the output axis (42, 20*(2+nc)).
    w1 = jnp.concatenate([wt1, wp1] + [wc1[c] for c in range(num_class)], axis=1)
    blk_1 = block(w1)

    # Stage 2: block-diagonal second layer (80, nc + 20*(1+nc)).
    w2 = jnp.zeros((HID * (2 + num_class), num_class + HID * (1 + num_class)), jnp.float32)
    w2 = w2.at[0:HID, 0:num_class].set(wt2)
    w2 = w2.at[HID:2 * HID, num_class:num_class + HID].set(wp2)
    for c in range(num_class):
        r0 = 2 * HID + c * HID
        c0 = num_class + HID + c * HID
        w2 = w2.at[r0:r0 + HID, c0:c0 + HID].set(wc2[c])
    blk_2 = block(w2)

    # Stage 3: block-diagonal third layer, rows indexed by h2 column positions
    # (task-logit columns [0:nc] of h2 map to zero rows).
    w3 = jnp.zeros((HID * (1 + num_class), num_domain * (1 + num_class)), jnp.float32)
    w3 = w3.at[0:HID, 0:num_domain].set(wp3)
    for c in range(num_class):
        w3 = w3.at[HID * (1 + c):HID * (2 + c),
                   num_domain * (1 + c):num_domain * (2 + c)].set(wc3[c])
    blk_3 = block(w3, row_off=num_class)

    # Bias rows (one 8x128 tile).
    b1 = jnp.concatenate([bt1, bp1] + [bc1[c] for c in range(num_class)], axis=1)
    b2 = jnp.concatenate([bt2, bp2] + [bc2[c] for c in range(num_class)], axis=1)
    b3 = jnp.concatenate([bp3] + [bc3[c] for c in range(num_class)], axis=1)
    bias_blk = jnp.zeros((8, LANES), jnp.float32)
    bias_blk = bias_blk.at[0, 0:bf.shape[1]].set(bf[0])
    bias_blk = bias_blk.at[1, 0:b1.shape[1]].set(b1[0])
    bias_blk = bias_blk.at[2, 0:b2.shape[1]].set(b2[0])
    bias_blk = bias_blk.at[3, 0:b3.shape[1]].set(b3[0])

    return jnp.concatenate([blk_f, blk_1, blk_2, blk_3, bias_blk], axis=0)   # (520, 128)


# ---------------------------------------------------------------------------
# Wrapper
# ---------------------------------------------------------------------------
def _round_up(v, m):
    return (v + m - 1) // m * m


@functools.partial(jax.jit,
                   static_argnames=("channel_num", "num_class", "num_domain", "tile_b"))
def cdann_forward(x, y, w_slab, *, channel_num=30, num_class=2, num_domain=6,
                  tile_b=512):
    """x: [B, channel_num] f32, y: [B] int labels, w_slab: packed (520,128) params.
    Returns (task_predict, pd_predict, cd_predicts). PyTorch overwrites cd_predicts
    in place; here a fresh array is returned (so it is not taken as an argument)."""
    batch = x.shape[0]
    # Batch tile: small batches stay a single (8-aligned) block; large batches are
    # tiled at <=512 rows (f32, 128 lanes, double-buffered -> ~1 MiB VMEM, safe on
    # v5e/v6e/v7x scoped-VMEM defaults) and split "parallel" across cores.
    tb = min(_round_up(batch, 8), tile_b)
    grid_b = pl.cdiv(batch, tb)
    b_pad = grid_b * tb

    x_pad = jnp.zeros((b_pad, LANES), jnp.float32)
    x_pad = x_pad.at[:batch, :channel_num].set(x.astype(jnp.float32))
    y_pad = jnp.zeros((b_pad, 1), jnp.int32).at[:batch, 0].set(y.astype(jnp.int32))

    kernel = functools.partial(cdann_kernel, num_class=num_class, num_domain=num_domain)
    out = pl.pallas_call(
        kernel,
        out_shape=jax.ShapeDtypeStruct((b_pad, LANES), jnp.float32),
        grid_spec=pltpu.PrefetchScalarGridSpec(
            num_scalar_prefetch=0,
            grid=(grid_b,),
            in_specs=[
                pl.BlockSpec((tb, LANES), lambda i: (i, 0)),       # x batch tile
                pl.BlockSpec((tb, 1), lambda i: (i, 0)),           # y batch tile
                pl.BlockSpec(w_slab.shape, lambda i: (0, 0)),      # weights: VMEM-resident
            ],
            out_specs=pl.BlockSpec((tb, LANES), lambda i: (i, 0)),
        ),
        compiler_params=pltpu.CompilerParams(
            dimension_semantics=("parallel",)),
    )(x_pad, y_pad, w_slab)

    task_predict = out[:batch, 0:num_class]
    pd_predict = out[:batch, num_class:num_class + num_domain]
    cd_predicts = out[:batch, num_class + num_domain:num_class + 2 * num_domain]
    return task_predict, pd_predict, cd_predicts


# ---------------------------------------------------------------------------
# Pure-JAX reference (unfused) for validation
# ---------------------------------------------------------------------------
def cdann_reference(x, y, params, num_class, num_domain):
    (wf, bf, wt1, bt1, wt2, bt2,
     wp1, bp1, wp2, bp2, wp3, bp3,
     wc1, bc1, wc2, bc2, wc3, bc3) = params
    relu = lambda v: jnp.maximum(v, 0.0)
    fea = relu(x @ wf + bf)
    task = relu(fea @ wt1 + bt1) @ wt2 + bt2
    h = relu(relu(fea @ wp1 + bp1) @ wp2 + bp2)
    pd = h @ wp3 + bp3
    cd = jnp.zeros((x.shape[0], num_domain), jnp.float32)
    for c in range(num_class):
        hc = relu(relu(fea @ wc1[c] + bc1[c]) @ wc2[c] + bc2[c])
        oc = hc @ wc3[c] + bc3[c]
        cd = cd + (y[:, None] == c).astype(jnp.float32) * oc
    return task, pd, cd


if __name__ == "__main__":
    batch, channel_num, num_class, num_domain = 8, 30, 2, 6

    key = jax.random.PRNGKey(0)
    k_param, k_x, k_y = jax.random.split(key, 3)

    params = make_cdann_params(k_param, channel_num, num_class, num_domain)
    w_slab = pack_cdann_params(params, channel_num, num_class, num_domain)

    x = jax.random.normal(k_x, (batch, channel_num), jnp.float32)
    y = jax.random.randint(k_y, (batch,), 0, num_class, jnp.int32)

    task_predict, pd_predict, cd_out = cdann_forward(
        x, y, w_slab, channel_num=channel_num,
        num_class=num_class, num_domain=num_domain)
    jax.block_until_ready((task_predict, pd_predict, cd_out))

    assert task_predict.shape == (batch, num_class)
    assert pd_predict.shape == (batch, num_domain)
    assert cd_out.shape == (batch, num_domain)

    # Validate the fused kernel against the unfused pure-JAX reference.
    t_ref, p_ref, c_ref = cdann_reference(x, y, params, num_class, num_domain)
    assert jnp.allclose(task_predict, t_ref, rtol=2e-4, atol=2e-4)
    assert jnp.allclose(pd_predict, p_ref, rtol=2e-4, atol=2e-4)
    assert jnp.allclose(cd_out, c_ref, rtol=2e-4, atol=2e-4)

    print("KERNEL_OK")
</pallas_src>

<mosaic_0001>
module attributes {stable_mosaic.version = 11 : i64} {
  func.func @cdann_kernel(%arg0: i32, %arg1: memref<8x128xf32, #tpu.memory_space<vmem>>, %arg2: memref<8x1xi32, #tpu.memory_space<vmem>>, %arg3: memref<520x128xf32, #tpu.memory_space<vmem>>, %arg4: memref<8x128xf32, #tpu.memory_space<vmem>>) attributes {dimension_semantics = [#tpu.dimension_semantics<parallel>], iteration_bounds = array<i64: 1>, scalar_prefetch = 0 : i64, scratch_operands = 0 : i64, tpu.core_type = #tpu.core_type<tc>, window_params = [{transform_indices = @transform_0, window_bounds = array<i64: 8, 128>}, {transform_indices = @transform_1, window_bounds = array<i64: 8, 1>}, {pipeline_mode = #tpu.pipeline_mode<synchronous>, transform_indices = @transform_2, window_bounds = array<i64: 520, 128>}, {transform_indices = @transform_3, window_bounds = array<i64: 8, 128>}]} {
    %c0 = arith.constant 0 : index
    %c0_0 = arith.constant 0 : index
    %0 = vector.load %arg1[%c0, %c0_0] : memref<8x128xf32, #tpu.memory_space<vmem>>, vector<8x128xf32>
    %c0_1 = arith.constant 0 : index
    %c0_2 = arith.constant 0 : index
    %1 = vector.load %arg2[%c0_1, %c0_2] : memref<8x1xi32, #tpu.memory_space<vmem>>, vector<8x1xi32>
    %c0_3 = arith.constant 0 : index
    %c0_4 = arith.constant 0 : index
    %2 = vector.load %arg3[%c0_3, %c0_4] : memref<520x128xf32, #tpu.memory_space<vmem>>, vector<128x128xf32>
    %c128 = arith.constant 128 : index
    %c0_5 = arith.constant 0 : index
    %3 = vector.load %arg3[%c128, %c0_5] : memref<520x128xf32, #tpu.memory_space<vmem>>, vector<128x128xf32>
    %c256 = arith.constant 256 : index
    %c0_6 = arith.constant 0 : index
    %4 = vector.load %arg3[%c256, %c0_6] : memref<520x128xf32, #tpu.memory_space<vmem>>, vector<128x128xf32>
    %c384 = arith.constant 384 : index
    %c0_7 = arith.constant 0 : index
    %5 = vector.load %arg3[%c384, %c0_7] : memref<520x128xf32, #tpu.memory_space<vmem>>, vector<128x128xf32>
    %c512 = arith.constant 512 : index
    %c0_8 = arith.constant 0 : index
    %6 = vector.load %arg3[%c512, %c0_8] : memref<520x128xf32, #tpu.memory_space<vmem>>, vector<1x128xf32>
    %c513 = arith.constant 513 : index
    %c0_9 = arith.constant 0 : index
    %7 = vector.load %arg3[%c513, %c0_9] : memref<520x128xf32, #tpu.memory_space<vmem>>, vector<1x128xf32>
    %c514 = arith.constant 514 : index
    %c0_10 = arith.constant 0 : index
    %8 = vector.load %arg3[%c514, %c0_10] : memref<520x128xf32, #tpu.memory_space<vmem>>, vector<1x128xf32>
    %c515 = arith.constant 515 : index
    %c0_11 = arith.constant 0 : index
    %9 = vector.load %arg3[%c515, %c0_11] : memref<520x128xf32, #tpu.memory_space<vmem>>, vector<1x128xf32>
    %cst = arith.constant dense<0.000000e+00> : vector<8x128xf32>
    %10 = tpu.matmul %0, %2, %cst {dimension_numbers = #tpu.dot_dimension_numbers<[1], [0], [0], [1], [0, 0, 1, 1], [], []>} : vector<8x128xf32>, vector<128x128xf32>, vector<8x128xf32> -> vector<8x128xf32>
    %11 = vector.broadcast %6 : vector<1x128xf32> to vector<8x128xf32>
    %12 = arith.addf %10, %11 : vector<8x128xf32>
    %cst_12 = arith.constant 0.000000e+00 : f32
    %13 = vector.broadcast %cst_12 : f32 to vector<8x128xf32>
    %14 = arith.maximumf %12, %13 : vector<8x128xf32>
    %cst_13 = arith.constant dense<0.000000e+00> : vector<8x128xf32>
    %15 = tpu.matmul %14, %3, %cst_13 {dimension_numbers = #tpu.dot_dimension_numbers<[1], [0], [0], [1], [0, 0, 1, 1], [], []>} : vector<8x128xf32>, vector<128x128xf32>, vector<8x128xf32> -> vector<8x128xf32>
    %16 = vector.broadcast %7 : vector<1x128xf32> to vector<8x128xf32>
    %17 = arith.addf %15, %16 : vector<8x128xf32>
    %cst_14 = arith.constant 0.000000e+00 : f32
    %18 = vector.broadcast %cst_14 : f32 to vector<8x128xf32>
    %19 = arith.maximumf %17, %18 : vector<8x128xf32>
    %cst_15 = arith.constant dense<0.000000e+00> : vector<8x128xf32>
    %20 = tpu.matmul %19, %4, %cst_15 {dimension_numbers = #tpu.dot_dimension_numbers<[1], [0], [0], [1], [0, 0, 1, 1], [], []>} : vector<8x128xf32>, vector<128x128xf32>, vector<8x128xf32> -> vector<8x128xf32>
    %21 = vector.broadcast %8 : vector<1x128xf32> to vector<8x128xf32>
    %22 = arith.addf %20, %21 : vector<8x128xf32>
    %cst_16 = arith.constant 0.000000e+00 : f32
    %23 = vector.broadcast %cst_16 : f32 to vector<8x128xf32>
    %24 = arith.maximumf %22, %23 : vector<8x128xf32>
    %cst_17 = arith.constant dense<0.000000e+00> : vector<8x128xf32>
    %25 = tpu.matmul %24, %5, %cst_17 {dimension_numbers = #tpu.dot_dimension_numbers<[1], [0], [0], [1], [0, 0, 1, 1], [], []>} : vector<8x128xf32>, vector<128x128xf32>, vector<8x128xf32> -> vector<8x128xf32>
    %26 = vector.broadcast %9 : vector<1x128xf32> to vector<8x128xf32>
    %27 = arith.addf %25, %26 : vector<8x128xf32>
    %28 = vector.extract_strided_slice %22 {offsets = [0, 0], sizes = [8, 2], strides = [1, 1]} : vector<8x128xf32> to vector<8x2xf32>
    %29 = vector.extract_strided_slice %27 {offsets = [0, 0], sizes = [8, 6], strides = [1, 1]} : vector<8x128xf32> to vector<8x6xf32>
    %cst_18 = arith.constant 0.000000e+00 : f32
    %30 = vector.broadcast %cst_18 : f32 to vector<8x6xf32>
    %c0_i32 = arith.constant 0 : i32
    %31 = vector.broadcast %c0_i32 : i32 to vector<8x1xi32>
    %32 = arith.cmpi eq, %1, %31 : vector<8x1xi32>
    %33 = arith.extui %32 : vector<8x1xi1> to vector<8x1xi32>
    %34 = arith.sitofp %33 : vector<8x1xi32> to vector<8x1xf32>
    %35 = vector.extract_strided_slice %27 {offsets = [0, 6], sizes = [8, 6], strides = [1, 1]} : vector<8x128xf32> to vector<8x6xf32>
    %36 = vector.broadcast %34 : vector<8x1xf32> to vector<8x6xf32>
    %37 = arith.mulf %36, %35 : vector<8x6xf32>
    %38 = arith.addf %30, %37 : vector<8x6xf32>
    %c1_i32 = arith.constant 1 : i32
    %39 = vector.broadcast %c1_i32 : i32 to vector<8x1xi32>
    %40 = arith.cmpi eq, %1, %39 : vector<8x1xi32>
    %41 = arith.extui %40 : vector<8x1xi1> to vector<8x1xi32>
    %42 = arith.sitofp %41 : vector<8x1xi32> to vector<8x1xf32>
    %43 = vector.extract_strided_slice %27 {offsets = [0, 12], sizes = [8, 6], strides = [1, 1]} : vector<8x128xf32> to vector<8x6xf32>
    %44 = vector.broadcast %42 : vector<8x1xf32> to vector<8x6xf32>
    %45 = arith.mulf %44, %43 : vector<8x6xf32>
    %46 = arith.addf %38, %45 : vector<8x6xf32>
    %cst_19 = arith.constant 0.000000e+00 : f32
    %47 = vector.broadcast %cst_19 : f32 to vector<8x128xf32>
    %c0_20 = arith.constant 0 : index
    %c0_21 = arith.constant 0 : index
    %48 = vector.load %arg4[%c0_20, %c0_21] : memref<8x128xf32, #tpu.memory_space<vmem>>, vector<8x128xf32>
    tpu.vector_store %arg4[%c0_20, %c0_21], %47 {strides = array<i32>} : memref<8x128xf32, #tpu.memory_space<vmem>>, vector<8x128xf32>,
    %c0_22 = arith.constant 0 : index
    %c0_23 = arith.constant 0 : index
    %49 = vector.load %arg4[%c0_22, %c0_23] : memref<8x128xf32, #tpu.memory_space<vmem>>, vector<8x2xf32>
    tpu.vector_store %arg4[%c0_22, %c0_23], %28 {strides = array<i32>} : memref<8x128xf32, #tpu.memory_space<vmem>>, vector<8x2xf32>,
    %c0_24 = arith.constant 0 : index
    %c2 = arith.constant 2 : index
    %50 = vector.load %arg4[%c0_24, %c2] : memref<8x128xf32, #tpu.memory_space<vmem>>, vector<8x6xf32>
    tpu.vector_store %arg4[%c0_24, %c2], %29 {strides = array<i32>} : memref<8x128xf32, #tpu.memory_space<vmem>>, vector<8x6xf32>,
    %c0_25 = arith.constant 0 : index
    %c8 = arith.constant 8 : index
    %51 = vector.load %arg4[%c0_25, %c8] : memref<8x128xf32, #tpu.memory_space<vmem>>, vector<8x6xf32>
    tpu.vector_store %arg4[%c0_25, %c8], %46 {strides = array<i32>} : memref<8x128xf32, #tpu.memory_space<vmem>>, vector<8x6xf32>,
    return
  }
  func.func @transform_0(%arg0: i32) -> (i32, i32) {
    %c0_i32 = arith.constant 0 : i32
    %c0_i32_0 = arith.constant 0 : i32
    return %arg0, %c0_i32 : i32, i32
  }
  func.func @transform_1(%arg0: i32) -> (i32, i32) {
    %c0_i32 = arith.constant 0 : i32
    %c0_i32_0 = arith.constant 0 : i32
    return %arg0, %c0_i32 : i32, i32
  }
  func.func @transform_2(%arg0: i32) -> (i32, i32) {
    %c0_i32 = arith.constant 0 : i32
    %c0_i32_0 = arith.constant 0 : i32
    %c0_i32_1 = arith.constant 0 : i32
    return %c0_i32, %c0_i32_0 : i32, i32
  }
  func.func @transform_3(%arg0: i32) -> (i32, i32) {
    %c0_i32 = arith.constant 0 : i32
    %c0_i32_0 = arith.constant 0 : i32
    return %arg0, %c0_i32 : i32, i32
  }
}

</mosaic_0001>

<bundles_post_ra>
// kernel: cdann_forward.1
= control target key start
LH: loop header
LB: loop body
LE: loop exit
PB: predicated region body
PF: predicated region fallthrough
CT: control target
= control target key end

     0   :  { %8 = vsyncpa [#allocation3], 0  ;;  %s271_s15 = smov [#allocation2]   ;;  %s272_s17 = smov 128   ;;  %s319_s0 = inlined_call_operand.vmem [shape: f32[8,128], index: 0, kind: input, shape index: {}]   ;;  %s320_s1 = inlined_call_operand.vmem [shape: s32[8,1], index: 1, kind: input, shape index: {}]   ;;  %s321_s2 = inlined_call_operand.hbm [shape: f32[520,128], index: 2, kind: input, shape index: {}]   ;;  %s322_s3 = inlined_call_operand.vmem [shape: f32[8,128], index: 3, kind: output, shape index: {}]  }
   0x1   :  { %s17_s14 = sshll.u32 %s321_s2, 4  ;;  %s19_s16 = sshll.u32 %s271_s15, 4  ;;  %s18_s14 = int_to_ptr.hbm [resolvable:$true] %s17_s14  ;;  %s20_s16 = int_to_ptr.vmem [resolvable:$true] %s19_s16 }
   0x2   :  { %s273_s18 = smov 8  }
   0x3   :  { %25 = dma.hbm_to_vmem [thread:$0]  %s18_s14, 8320, %s20_s16, [#allocation3], %s272_s17, %s272_s17, %s273_s18  }
   0x4   :  { %269 = dma.done.wait [#allocation3], 8320  }
   0x5   :  { %270 = vsyncadd [#allocation3], 4294958976  ;;  %v47_v0 = vld [vmem:[#allocation2 + $0x78] sm:$0xff]  ;;  %v46_v1 = vld [vmem:[#allocation2 + $0x70] sm:$0xff]  ;;  %vm212_vm2 = vcmask 15360   ;;  %s277_s25 = smov 2  }
   0x6   :  { %101 = vmatpush.msra.mxu0 %v47_v0  ;;  %v45_v2 = vld [vmem:[#allocation2 + $0x68] sm:$0xff]  ;;  %v44_v3 = vld [vmem:[#allocation2 + $0x60] sm:$0xff]  ;;  %v63_v4 = vld [vmem:[#allocation2 + $0xf8] sm:$0xff]  ;;  %vm218_vm3 = vcmask 64528   ;;  %vm224_vm4 = vcmask 113728  }
   0x7   :  { %v43_v5 = vld [vmem:[#allocation2 + $0x58] sm:$0xff]  ;;  %123 = vmatpush.msra.mxu1 %v63_v4  ;;  %v62_v6 = vld [vmem:[#allocation2 + $0xf0] sm:$0xff]  ;;  %v61_v7 = vld [vmem:[#allocation2 + $0xe8] sm:$0xff] }
   0x8   :  { %102 = vmatpush.msra.mxu0 %v46_v1  ;;  %v42_v8 = vld [vmem:[#allocation2 + $0x50] sm:$0xff]  ;;  %v60_v9 = vld [vmem:[#allocation2 + $0xe0] sm:$0xff]  ;;  %v41_v10 = vld [vmem:[#allocation2 + $0x48] sm:$0xff] }
   0x9   :  { %124 = vmatpush.msra.mxu1 %v62_v6  ;;  %v59_v11 = vld [vmem:[#allocation2 + $0xd8] sm:$0xff]  ;;  %v40_v12 = vld [vmem:[#allocation2 + $0x40] sm:$0xff]  ;;  %v58_v13 = vld [vmem:[#allocation2 + $0xd0] sm:$0xff] }
   0xa   :  { %103 = vmatpush.msra.mxu0 %v45_v2  ;;  %v39_v14 = vld [vmem:[#allocation2 + $0x38] sm:$0xff]  ;;  %v57_v15 = vld [vmem:[#allocation2 + $0xc8] sm:$0xff]  ;;  %v38_v16 = vld [vmem:[#allocation2 + $0x30] sm:$0xff] }
   0xb   :  { %125 = vmatpush.msra.mxu1 %v61_v7  ;;  %v56_v17 = vld [vmem:[#allocation2 + $0xc0] sm:$0xff]  ;;  %v37_v18 = vld [vmem:[#allocation2 + $0x28] sm:$0xff]  ;;  %v55_v19 = vld [vmem:[#allocation2 + $0xb8] sm:$0xff] }
   0xc   :  { %104 = vmatpush.msra.mxu0 %v44_v3  ;;  %v36_v20 = vld [vmem:[#allocation2 + $0x20] sm:$0xff]  ;;  %v54_v21 = vld [vmem:[#allocation2 + $0xb0] sm:$0xff]  ;;  %v35_v22 = vld [vmem:[#allocation2 + $0x18] sm:$0xff] }
   0xd   :  { %126 = vmatpush.msra.mxu1 %v60_v9  ;;  %v53_v23 = vld [vmem:[#allocation2 + $0xa8] sm:$0xff]  ;;  %v34_v24 = vld [vmem:[#allocation2 + $0x10] sm:$0xff]  ;;  %v52_v25 = vld [vmem:[#allocation2 + $0xa0] sm:$0xff]  ;;  %v274_v9 = vmov 0.0  }
   0xe   :  { %105 = vmatpush.msra.mxu0 %v43_v5  ;;  %v33_v26 = vld [vmem:[#allocation2 + $0x8] sm:$0xff]  ;;  %v51_v27 = vld [vmem:[#allocation2 + $0x98] sm:$0xff]  ;;  %v32_v28 = vld [vmem:[#allocation2] sm:$0xff]  ;;  %211 = vst [vmem:[%s322_s3] sm:$0xff] %v274_v9 }
   0xf   :  { %127 = vmatpush.msra.mxu1 %v59_v11  ;;  %v30_v29 = vld [vmem:[%s319_s0] sm:$0xff]  ;;  %v50_v30 = vld [vmem:[#allocation2 + $0x90] sm:$0xff]  ;;  %v49_v31 = vld [vmem:[#allocation2 + $0x88] sm:$0xff]  ;;  %v275_v11 = vmov 0  }
  0x10   :  { %106 = vmatpush.msra.mxu0 %v42_v8  ;;  %v48_v32 = vld [vmem:[#allocation2 + $0x80] sm:$0xff]  ;;  %v79_v33 = vld [vmem:[#allocation2 + $0x178] sm:$0xff]  ;;  %v78_v34 = vld [vmem:[#allocation2 + $0x170] sm:$0xff]  ;;  %240 = vset.pattern.permute.xlu0 %v275_v11 }
  0x11   :  { %128 = vmatpush.msra.mxu1 %v58_v13  ;;  %145 = vmatpush.msra.mxu2 %v79_v33  ;;  %v77_v35 = vld [vmem:[#allocation2 + $0x168] sm:$0xff]  ;;  %v76_v36 = vld [vmem:[#allocation2 + $0x160] sm:$0xff]  ;;  %v75_v37 = vld [vmem:[#allocation2 + $0x158] sm:$0xff] }
  0x12   :  { %107 = vmatpush.msra.mxu0 %v41_v10  ;;  %v74_v38 = vld [vmem:[#allocation2 + $0x150] sm:$0xff]  ;;  %v73_v39 = vld [vmem:[#allocation2 + $0x148] sm:$0xff]  ;;  %v72_v40 = vld [vmem:[#allocation2 + $0x140] sm:$0xff] }
  0x13   :  { %129 = vmatpush.msra.mxu1 %v57_v15  ;;  %146 = vmatpush.msra.mxu2 %v78_v34  ;;  %v71_v41 = vld [vmem:[#allocation2 + $0x138] sm:$0xff]  ;;  %v70_v42 = vld [vmem:[#allocation2 + $0x130] sm:$0xff]  ;;  %v69_v43 = vld [vmem:[#allocation2 + $0x128] sm:$0xff] }
  0x14   :  { %108 = vmatpush.msra.mxu0 %v40_v12  ;;  %v68_v44 = vld [vmem:[#allocation2 + $0x120] sm:$0xff]  ;;  %v67_v45 = vld [vmem:[#allocation2 + $0x118] sm:$0xff]  ;;  %v66_v50 = vld [vmem:[#allocation2 + $0x110] sm:$0xff] }
  0x15   :  { %130 = vmatpush.msra.mxu1 %v56_v17  ;;  %147 = vmatpush.msra.mxu2 %v77_v35  ;;  %v241_v46 = vld [vmem:[#allocation2 + $0x200] ss:$0 sm:$0xff]  ;;  %v65_v51 = vld [vmem:[#allocation2 + $0x108] sm:$0xff]  ;;  %v95_v53 = vld [vmem:[#allocation2 + $0x1f8] sm:$0xff] }
  0x16   :  { %109 = vmatpush.msra.mxu0 %v39_v14  ;;  %v64_v52 = vld [vmem:[#allocation2 + $0x100] sm:$0xff]  ;;  %v94_v54 = vld [vmem:[#allocation2 + $0x1f0] sm:$0xff]  ;;  %167 = vmatpush.msra.mxu3 %v95_v53  ;;  %v93_v55 = vld [vmem:[#allocation2 + $0x1e8] sm:$0xff] }
  0x17   :  { %131 = vmatpush.msra.mxu1 %v55_v19  ;;  %148 = vmatpush.msra.mxu2 %v76_v36  ;;  %v92_v56 = vld [vmem:[#allocation2 + $0x1e0] sm:$0xff]  ;;  %v91_v57 = vld [vmem:[#allocation2 + $0x1d8] sm:$0xff]  ;;  %v90_v58 = vld [vmem:[#allocation2 + $0x1d0] sm:$0xff] }
  0x18   :  { %110 = vmatpush.msra.mxu0 %v38_v16  ;;  %168 = vmatpush.msra.mxu3 %v94_v54  ;;  %v89_v59 = vld [vmem:[#allocation2 + $0x1c8] sm:$0xff]  ;;  %v88_v60 = vld [vmem:[#allocation2 + $0x1c0] sm:$0xff]  ;;  %v87_v61 = vld [vmem:[#allocation2 + $0x1b8] sm:$0xff] }
  0x19   :  { %132 = vmatpush.msra.mxu1 %v54_v21  ;;  %149 = vmatpush.msra.mxu2 %v75_v37  ;;  %v86_v62 = vld [vmem:[#allocation2 + $0x1b0] sm:$0xff]  ;;  %v85_v63 = vld [vmem:[#allocation2 + $0x1a8] sm:$0xff]  ;;  %v84_v0 = vld [vmem:[#allocation2 + $0x1a0] sm:$0xff] }
  0x1a   :  { %111 = vmatpush.msra.mxu0 %v37_v18  ;;  %169 = vmatpush.msra.mxu3 %v93_v55  ;;  %v83_v1 = vld [vmem:[#allocation2 + $0x198] sm:$0xff]  ;;  %v242_v2 = vld [vmem:[#allocation2 + $0x201] ss:$0 sm:$0xff]  ;;  %v82_v6 = vld [vmem:[#allocation2 + $0x190] sm:$0xff] }
  0x1b   :  { %133 = vmatpush.msra.mxu1 %v53_v23  ;;  %150 = vmatpush.msra.mxu2 %v74_v38  ;;  %v81_v7 = vld [vmem:[#allocation2 + $0x188] sm:$0xff]  ;;  %v80_v8 = vld [vmem:[#allocation2 + $0x180] sm:$0xff] }
  0x1c   :  { %112 = vmatpush.msra.mxu0 %v36_v20  ;;  %170 = vmatpush.msra.mxu3 %v92_v56  ;;  %v31_v10 = vld [vmem:[%s320_s1] sm:$0xff]  ;;  %s276_s1 = smov 122  }
  0x1d   :  { %134 = vmatpush.msra.mxu1 %v52_v25  ;;  %151 = vmatpush.msra.mxu2 %v73_v39  ;;  %vm197_vm0 = vcmp.eq.s32.totalorder %v31_v10, 1  ;;  %vm187_vm1 = vcmp.eq.s32.totalorder %v31_v10, 0  ;;  %v243_v14 = vld [vmem:[#allocation2 + $0x202] ss:$0 sm:$0xff]  ;;  %v244_v18 = vld [vmem:[#allocation2 + $0x203] ss:$0 sm:$0xff] }
  0x1e   :  { %113 = vmatpush.msra.mxu0 %v35_v22  ;;  %171 = vmatpush.msra.mxu3 %v91_v57  ;;  %v232_v12 = vsel %vm197_vm0, 1.0, %v274_v9  ;;  %v231_v13 = vsel %vm187_vm1, 1.0, %v274_v9 }
  0x1f   :  { %135 = vmatpush.msra.mxu1 %v51_v27  ;;  %152 = vmatpush.msra.mxu2 %v72_v40 }
  0x20   :  { %114 = vmatpush.msra.mxu0 %v34_v24  ;;  %172 = vmatpush.msra.mxu3 %v90_v58 }
  0x21   :  { %136 = vmatpush.msra.mxu1 %v50_v30  ;;  %153 = vmatpush.msra.mxu2 %v71_v41 }
  0x22   :  { %115 = vmatpush.msra.mxu0 %v33_v26  ;;  %173 = vmatpush.msra.mxu3 %v89_v59 }
  0x23   :  { %137 = vmatpush.msra.mxu1 %v49_v31  ;;  %154 = vmatpush.msra.mxu2 %v70_v42 }
  0x24   :  { %116 = vmatpush.msra.mxu0 %v32_v28  ;;  %174 = vmatpush.msra.mxu3 %v88_v60 }
  0x25   :  { %117 = vmatmul.f32.vlgmr.msra.gmra.mxu0 %v30_v29  ;;  %138 = vmatpush.msra.mxu1 %v48_v32 }
  0x26   :  { %155 = vmatpush.msra.mxu2 %v69_v43  ;;  %175 = vmatpush.msra.mxu3 %v87_v61 }
  0x27   :  { %202 = vperm.xlu0 %240, %v232_v12  }
  0x28   :  { %156 = vmatpush.msra.mxu2 %v68_v44  ;;  %176 = vmatpush.msra.mxu3 %v86_v62 }
  0x2a   :  { %157 = vmatpush.msra.mxu2 %v67_v45  ;;  %177 = vmatpush.msra.mxu3 %v85_v63 }
  0x2c   :  { %158 = vmatpush.msra.mxu2 %v66_v50  ;;  %178 = vmatpush.msra.mxu3 %v84_v0 }
  0x2e   :  { %159 = vmatpush.msra.mxu2 %v65_v51  ;;  %179 = vmatpush.msra.mxu3 %v83_v1 }
  0x2f   :  { %192 = vperm.xlu0 %240, %v231_v13  }
  0x30   :  { %160 = vmatpush.msra.mxu2 %v64_v52  ;;  %180 = vmatpush.msra.mxu3 %v82_v6 }
  0x32   :  { %181 = vmatpush.msra.mxu3 %v81_v7 }
  0x34   :  { %182 = vmatpush.msra.mxu3 %v80_v8 }
  0x99   :  { %v203_v21 = vpop.permute.xlu0 %202 }
  0xa1   :  { %v193_v23 = vpop.permute.xlu0 %192 }
  0xa2   :  { %v118_v47 = vpop.f32.mrf.mxu0 }
  0xa3   :  { %v119_v48 = vadd.f32 %v241_v46, %v118_v47 }
  0xa5   :  { %v121_v49 = vmax.f32 %v119_v48, 0.0 }
  0xa7   :  { %139 = vmatmul.f32.vlgmr.msra.gmra.mxu1 %v121_v49 }
 0x124   :  { %v140_v3 = vpop.f32.mrf.mxu1 }
 0x125   :  { %v141_v4 = vadd.f32 %v242_v2, %v140_v3 }
 0x127   :  { %v143_v5 = vmax.f32 %v141_v4, 0.0 }
 0x129   :  { %161 = vmatmul.f32.vlgmr.msra.gmra.mxu2 %v143_v5 }
 0x1ac   :  { %v162_v15 = vpop.f32.mrf.mxu2 }
 0x1ad   :  { %v163_v16 = vadd.f32 %v243_v14, %v162_v15 }
 0x1af   :  { %v165_v17 = vmax.f32 %v163_v16, 0.0  ;;  %213 = vst.msk [vmem:[%s322_s3] sm:$0xff] %vm212_vm2, %v163_v16 }
 0x1b1   :  { %183 = vmatmul.f32.vlgmr.msra.gmra.mxu3 %v165_v17 }
 0x234   :  { %v184_v19 = vpop.f32.mrf.mxu3 }
 0x235   :  { %v185_v20 = vadd.f32 %v244_v18, %v184_v19 }
 0x237   :  { %v205_v22 = vmul.f32 %v203_v21, %v185_v20  ;;  %v195_v24 = vmul.f32 %v193_v23, %v185_v20 }
 0x239   :  { %207 = vrot.lane.b32.xlu1 %v205_v22, %s276_s1 }
 0x241   :  { %215 = vrot.lane.b32.xlu1 %v185_v20, %s277_s25 }
 0x2ab   :  { %v208_v25 = vpop.permute.xlu1 %207 }
 0x2ac   :  { %v210_v26 = vadd.f32 %v208_v25, %v195_v24 }
 0x2ae   :  { %221 = vrot.lane.b32.xlu2 %v210_v26, %s277_s25 }
 0x2b3   :  { %v216_v27 = vpop.permute.xlu1 %215 }
 0x2b4   :  { %219 = vst.msk [vmem:[%s322_s3] sm:$0xff] %vm218_vm3, %v216_v27 }
 0x308   :  { %v222_v28 = vpop.permute.xlu2 %221 }
 0x309   :  { %225 = vst.msk [vmem:[%s322_s3] sm:$0xff] %vm224_vm4, %v222_v28 }
 0x30a   :  { %230 = vsyncpa [#allocation3], 1 }

</bundles_post_ra>
